<compile_context>
chip_gen: v5e
topology: v5e:2x2
jax: 0.10.0
libtpu: 0.0.40
codegen_flags: <defaults>
</compile_context>

<pallas_src>
import functools

import jax
import jax.numpy as jnp
from jax.experimental import pallas as pl
from jax.experimental.pallas import tpu as pltpu

EPSILON = 1e-8
_TARGET_TILE_BYTES = 2 * 1024 * 1024   # per-input pipeline block (f32 equivalent)

# Accumulator row layout (8 sublanes, full-width block):
#   0: sum(p_raw)   1: sum(t*p_raw)   2: sum(sigmoid(p))   3: sum(t*sigmoid(p))
#   4: sum(t)       5: min(p)         6: max(p)            7: unused
# In static modes ("logits"/"probs") rows 0/1 hold the effective-probability
# sums and rows 2/3/5/6 stay zero.


def _round_up(x: int, m: int) -> int:
    return ((x + m - 1) // m) * m


def _mcc_sums_kernel(preds_ref, targets_ref, out_ref, *, mode, lane, tile_rows,
                     rows_valid, needs_row_mask):
    k = pl.program_id(0)

    @pl.when(k == 0)
    def _init():
        init = jnp.zeros((8, lane), jnp.float32)
        if mode == "auto":
            row = jax.lax.broadcasted_iota(jnp.int32, (8, lane), 0)
            init = jnp.where(row == 5, jnp.inf, init)    # min accumulator
            init = jnp.where(row == 6, -jnp.inf, init)   # max accumulator
        out_ref[...] = init

    p = preds_ref[...].astype(jnp.float32)     # (tile_rows, lane)
    t = targets_ref[...].astype(jnp.float32)   # (tile_rows, lane)

    valid = None
    if needs_row_mask:
        gidx = k * tile_rows + jax.lax.broadcasted_iota(
            jnp.int32, (tile_rows, lane), 0)
        valid = gidx < rows_valid
        p = jnp.where(valid, p, 0.0)
        t = jnp.where(valid, t, 0.0)

    def rsum(x):
        return jnp.sum(x, axis=0, keepdims=True)   # (1, lane)

    sum_t = rsum(t)
    acc = out_ref[...]                             # (8, lane), VMEM-resident

    if mode == "auto":
        ps = jax.nn.sigmoid(p)                     # EUP; hidden under DMA
        if needs_row_mask:
            ps = jnp.where(valid, ps, 0.0)
            pmin_src = jnp.where(valid, p, jnp.inf)
            pmax_src = jnp.where(valid, p, -jnp.inf)
        else:
            pmin_src, pmax_src = p, p
        delta = jnp.concatenate(
            [rsum(p), rsum(t * p), rsum(ps), rsum(t * ps), sum_t], axis=0)
        new_sums = acc[0:5, :] + delta
        new_min = jnp.minimum(acc[5:6, :], jnp.min(pmin_src, axis=0, keepdims=True))
        new_max = jnp.maximum(acc[6:7, :], jnp.max(pmax_src, axis=0, keepdims=True))
        out_ref[...] = jnp.concatenate(
            [new_sums, new_min, new_max, acc[7:8, :]], axis=0)
    else:
        if mode == "logits":
            p_eff = jax.nn.sigmoid(p)
            if needs_row_mask:
                p_eff = jnp.where(valid, p_eff, 0.0)
        else:  # "probs"
            p_eff = p
        zero = jnp.zeros((1, lane), jnp.float32)
        delta = jnp.concatenate(
            [rsum(p_eff), rsum(t * p_eff), zero, zero, sum_t, zero, zero, zero],
            axis=0)
        out_ref[...] = acc + delta


def binary_mcc_loss(preds: jax.Array, targets: jax.Array, *,
                    epsilon: float = EPSILON,
                    from_logits=None,
                    max_tile_rows: int = 4096) -> jax.Array:
    """Pallas TPU implementation of BinaryMCCLoss.forward.

    preds, targets: (N, T).  Returns loss of shape (T,) float32.
    from_logits: None -> data-dependent check like torch (single streaming pass,
                 dual-branch accumulation); True/False -> static single branch.
    """
    assert preds.shape == targets.shape and preds.ndim == 2
    n, t = preds.shape
    mode = "auto" if from_logits is None else ("logits" if from_logits else "probs")

    # ---- lane-dense packing geometry -------------------------------------
    if t <= 128:
        t_pad = pl.next_power_of_2(max(t, 1))   # power of two => divides 128
        g = 128 // t_pad                        # batch rows folded per lane-row
    else:
        t_pad = _round_up(t, 128)
        g = 1
    lane = g * t_pad

    zero_copy = (t_pad == t) and (n % g == 0)
    n_pad = n if zero_copy else _round_up(max(n, 1), g)
    rows = n_pad // g

    if zero_copy:
        preds_p = preds.reshape(rows, lane)       # contiguous reshape, no copy
        targets_p = targets.reshape(rows, lane)
    else:
        # TODO(synk): genuinely ragged shapes (N % g != 0 or T not pow2 /
        # mult-of-128) still pay one padded copy per input; pre-pad upstream to
        # hit the zero-copy path.  Pads are zeros; sigmoid(0)=0.5 leakage is
        # subtracted exactly in the epilogue.
        preds_p = jnp.zeros((n_pad, t_pad), preds.dtype)
        preds_p = preds_p.at[:n, :t].set(preds).reshape(rows, lane)
        targets_p = jnp.zeros((n_pad, t_pad), targets.dtype)
        targets_p = targets_p.at[:n, :t].set(targets).reshape(rows, lane)

    # ---- pipeline geometry: big tiles, no wrapper padding for ragged grids
    cap = max(32, ((_TARGET_TILE_BYTES // (lane * 4)) // 32) * 32)
    tile_limit = max(32, min((max(max_tile_rows, 32) // 32) * 32, cap))
    if rows <= tile_limit:
        tile_rows, steps = rows, 1                # full-extent block (always legal)
    else:
        tile_rows = tile_limit                    # multiple of 32 (any input dtype)
        steps = pl.cdiv(rows, tile_rows)
    needs_row_mask = (steps * tile_rows) != rows  # ragged last block -> mask in kernel

    kernel = functools.partial(
        _mcc_sums_kernel, mode=mode, lane=lane, tile_rows=tile_rows,
        rows_valid=rows, needs_row_mask=needs_row_mask)

    partials = pl.pallas_call(
        kernel,
        out_shape=jax.ShapeDtypeStruct((8, lane), jnp.float32),
        grid_spec=pltpu.PrefetchScalarGridSpec(
            num_scalar_prefetch=0,
            grid=(steps,),
            in_specs=[
                pl.BlockSpec((tile_rows, lane), lambda k: (k, 0)),
                pl.BlockSpec((tile_rows, lane), lambda k: (k, 0)),
            ],
            out_specs=pl.BlockSpec((8, lane), lambda k: (0, 0)),
        ),
        compiler_params=pltpu.CompilerParams(
            dimension_semantics=("arbitrary",)),
    )(preds_p, targets_p)

    # ---- tiny O(T) epilogue: fold lane groups, pick branch, MCC formula ---
    parts = partials.reshape(8, g, t_pad)
    sums = jnp.sum(parts[0:5], axis=1)[:, :t]                   # (5, T)
    sum_p_raw, sum_tp_raw, sum_p_sig, sum_tp_sig, sum_t = sums  # each (T,)

    pad_rows = float(n_pad - n)   # zero-padded batch rows per kept column

    if mode == "auto":
        pmin = jnp.min(jnp.min(parts[5], axis=0)[:t])
        pmax = jnp.max(jnp.max(parts[6], axis=0)[:t])
        in_unit = jnp.logical_and(pmin >= 0.0, pmax <= 1.0)
        sum_p = jnp.where(in_unit, sum_p_raw, sum_p_sig - 0.5 * pad_rows)
        sum_tp = jnp.where(in_unit, sum_tp_raw, sum_tp_sig)
    elif mode == "logits":
        sum_p = sum_p_raw - 0.5 * pad_rows   # rows 0/1 hold sigmoid sums here
        sum_tp = sum_tp_raw
    else:  # "probs"
        sum_p, sum_tp = sum_p_raw, sum_tp_raw

    n_true = jnp.float32(n)
    tp = sum_tp
    fp = sum_p - tp
    fn = sum_t - tp
    tn = n_true - sum_t - sum_p + tp

    numerator = tp * tn - fp * fn
    den_sq = (tp + fp) * (tp + fn) * (tn + fp) * (tn + fn) + jnp.float32(epsilon)
    mcc = numerator * jax.lax.rsqrt(den_sq)
    return 1.0 - mcc


# ---------------------------------------------------------------------------
# Pure-JAX reference mirroring the torch module exactly (for validation).
def _reference(preds, targets, epsilon=EPSILON):
    preds = preds.astype(jnp.float32)
    targets = targets.astype(jnp.float32)
    p = jnp.where(
        jnp.logical_and(jnp.min(preds) >= 0.0, jnp.max(preds) <= 1.0),
        preds,
        jax.nn.sigmoid(preds),
    )
    tp = (targets * p).sum(0)
    fp = ((1 - targets) * p).sum(0)
    tn = ((1 - targets) * (1 - p)).sum(0)
    fn = (targets * (1 - p)).sum(0)
    num = tp * tn - fp * fn
    den = jnp.sqrt((tp + fp) * (tp + fn) * (tn + fp) * (tn + fn) + epsilon)
    return 1.0 - num / den


if __name__ == "__main__":
    key = jax.random.PRNGKey(0)
    k1, k2, k3, k4, k5 = jax.random.split(key, 5)

    # 1) Logits (sigmoid branch), nice shape -> zero-copy path, auto predicate.
    N, T = 64, 8
    preds = jax.random.normal(k1, (N, T), dtype=jnp.float32) * 2.0
    targets = jax.random.bernoulli(k2, 0.3, (N, T)).astype(jnp.float32)
    out = binary_mcc_loss(preds, targets)
    jax.block_until_ready(out)
    ref = _reference(preds, targets)
    assert out.shape == (T,)
    assert jnp.allclose(out, ref, atol=1e-4, rtol=1e-4), (out, ref)

    # 2) Probabilities already in [0, 1] -> other branch of the same auto kernel.
    preds_prob = jax.random.uniform(k3, (N, T), dtype=jnp.float32)
    out2 = binary_mcc_loss(preds_prob, targets)
    jax.block_until_ready(out2)
    ref2 = _reference(preds_prob, targets)
    assert jnp.allclose(out2, ref2, atol=1e-4, rtol=1e-4), (out2, ref2)

    # 3) Ragged shapes (N % g != 0, T not pow2) -> pad path + exact 0.5*pad fix.
    N3, T3 = 37, 5
    preds3 = jax.random.normal(k4, (N3, T3), dtype=jnp.float32)
    targets3 = jax.random.bernoulli(k2, 0.5, (N3, T3)).astype(jnp.float32)
    out3 = binary_mcc_loss(preds3, targets3)
    jax.block_until_ready(out3)
    ref3 = _reference(preds3, targets3)
    assert out3.shape == (T3,)
    assert jnp.allclose(out3, ref3, atol=1e-4, rtol=1e-4), (out3, ref3)

    # 4) Multi-step grid with ragged last block (in-kernel row mask), zero-copy.
    N4, T4 = 1040, 8   # rows = 65, tile 32 -> 3 steps, last block masked
    preds4 = jax.random.normal(k5, (N4, T4), dtype=jnp.float32)
    targets4 = jax.random.bernoulli(k2, 0.2, (N4, T4)).astype(jnp.float32)
    out4 = binary_mcc_loss(preds4, targets4, max_tile_rows=32)
    jax.block_until_ready(out4)
    ref4 = _reference(preds4, targets4)
    assert jnp.allclose(out4, ref4, atol=1e-4, rtol=1e-4), (out4, ref4)

    # 5) Static from_logits=True -> single-branch kernel (no min/max, no raw sums).
    out5 = binary_mcc_loss(preds, targets, from_logits=True)
    jax.block_until_ready(out5)
    assert jnp.allclose(out5, ref, atol=1e-4, rtol=1e-4), (out5, ref)

    print("KERNEL_OK")
</pallas_src>

<mosaic_0001>
module attributes {stable_mosaic.version = 11 : i64} {
  func.func @_mcc_sums_kernel(%arg0: i32, %arg1: memref<4x128xf32, #tpu.memory_space<vmem>>, %arg2: memref<4x128xf32, #tpu.memory_space<vmem>>, %arg3: memref<8x128xf32, #tpu.memory_space<vmem>>) attributes {dimension_semantics = [#tpu.dimension_semantics<arbitrary>], iteration_bounds = array<i64: 1>, scalar_prefetch = 0 : i64, scratch_operands = 0 : i64, tpu.core_type = #tpu.core_type<tc>, window_params = [{transform_indices = @transform_0, window_bounds = array<i64: 4, 128>}, {transform_indices = @transform_1, window_bounds = array<i64: 4, 128>}, {pipeline_mode = #tpu.pipeline_mode<synchronous>, transform_indices = @transform_2, window_bounds = array<i64: 8, 128>}]} {
    %c0_i32 = arith.constant 0 : i32
    %0 = arith.cmpi eq, %arg0, %c0_i32 : i32
    %1 = arith.extui %0 : i1 to i32
    %c0_i32_0 = arith.constant 0 : i32
    %2 = arith.cmpi ne, %1, %c0_i32_0 : i32
    scf.if %2 {
      %cst_15 = arith.constant 0.000000e+00 : f32
      %37 = vector.broadcast %cst_15 : f32 to vector<8x128xf32>
      %38 = tpu.iota {dimensions = array<i32: 0>} : vector<8x128xi32>
      %c5_i32 = arith.constant 5 : i32
      %39 = vector.broadcast %c5_i32 : i32 to vector<8x128xi32>
      %40 = arith.cmpi eq, %38, %39 : vector<8x128xi32>
      %cst_16 = arith.constant 0x7F800000 : f32
      %41 = vector.broadcast %cst_16 : f32 to vector<8x128xf32>
      %42 = arith.select %40, %41, %37 : vector<8x128xi1>, vector<8x128xf32>
      %c6_i32 = arith.constant 6 : i32
      %43 = vector.broadcast %c6_i32 : i32 to vector<8x128xi32>
      %44 = arith.cmpi eq, %38, %43 : vector<8x128xi32>
      %cst_17 = arith.constant 0xFF800000 : f32
      %45 = vector.broadcast %cst_17 : f32 to vector<8x128xf32>
      %46 = arith.select %44, %45, %42 : vector<8x128xi1>, vector<8x128xf32>
      %c0_18 = arith.constant 0 : index
      %c0_19 = arith.constant 0 : index
      %47 = vector.load %arg3[%c0_18, %c0_19] : memref<8x128xf32, #tpu.memory_space<vmem>>, vector<8x128xf32>
      tpu.vector_store %arg3[%c0_18, %c0_19], %46 {strides = array<i32>} : memref<8x128xf32, #tpu.memory_space<vmem>>, vector<8x128xf32>,
    } else {
    }
    %c0 = arith.constant 0 : index
    %c0_1 = arith.constant 0 : index
    %3 = vector.load %arg1[%c0, %c0_1] : memref<4x128xf32, #tpu.memory_space<vmem>>, vector<4x128xf32>
    %c0_2 = arith.constant 0 : index
    %c0_3 = arith.constant 0 : index
    %4 = vector.load %arg2[%c0_2, %c0_3] : memref<4x128xf32, #tpu.memory_space<vmem>>, vector<4x128xf32>
    %cst = arith.constant dense<0.000000e+00> : vector<128xf32>
    %5 = vector.multi_reduction <add>, %4, %cst [0] : vector<4x128xf32> to vector<128xf32>
    %6 = vector.shape_cast %5 : vector<128xf32> to vector<1x128xf32>
    %c0_4 = arith.constant 0 : index
    %c0_5 = arith.constant 0 : index
    %7 = vector.load %arg3[%c0_4, %c0_5] : memref<8x128xf32, #tpu.memory_space<vmem>>, vector<8x128xf32>
    %8 = arith.negf %3 : vector<4x128xf32>
    %9 = math.exp %8 : vector<4x128xf32>
    %cst_6 = arith.constant 1.000000e+00 : f32
    %10 = vector.broadcast %cst_6 : f32 to vector<4x128xf32>
    %11 = arith.addf %10, %9 : vector<4x128xf32>
    %12 = arith.divf %10, %11 : vector<4x128xf32>
    %cst_7 = arith.constant dense<0.000000e+00> : vector<128xf32>
    %13 = vector.multi_reduction <add>, %3, %cst_7 [0] : vector<4x128xf32> to vector<128xf32>
    %14 = vector.shape_cast %13 : vector<128xf32> to vector<1x128xf32>
    %15 = arith.mulf %4, %3 : vector<4x128xf32>
    %cst_8 = arith.constant dense<0.000000e+00> : vector<128xf32>
    %16 = vector.multi_reduction <add>, %15, %cst_8 [0] : vector<4x128xf32> to vector<128xf32>
    %17 = vector.shape_cast %16 : vector<128xf32> to vector<1x128xf32>
    %cst_9 = arith.constant dense<0.000000e+00> : vector<128xf32>
    %18 = vector.multi_reduction <add>, %12, %cst_9 [0] : vector<4x128xf32> to vector<128xf32>
    %19 = vector.shape_cast %18 : vector<128xf32> to vector<1x128xf32>
    %20 = arith.mulf %4, %12 : vector<4x128xf32>
    %cst_10 = arith.constant dense<0.000000e+00> : vector<128xf32>
    %21 = vector.multi_reduction <add>, %20, %cst_10 [0] : vector<4x128xf32> to vector<128xf32>
    %22 = vector.shape_cast %21 : vector<128xf32> to vector<1x128xf32>
    %23 = tpu.concatenate %14, %17, %19, %22, %6 in 0 : vector<1x128xf32>, vector<1x128xf32>, vector<1x128xf32>, vector<1x128xf32>, vector<1x128xf32> -> vector<5x128xf32>
    %24 = vector.extract_strided_slice %7 {offsets = [0, 0], sizes = [5, 128], strides = [1, 1]} : vector<8x128xf32> to vector<5x128xf32>
    %25 = arith.addf %24, %23 : vector<5x128xf32>
    %26 = vector.extract_strided_slice %7 {offsets = [5, 0], sizes = [1, 128], strides = [1, 1]} : vector<8x128xf32> to vector<1x128xf32>
    %cst_11 = arith.constant dense<0x7F800000> : vector<128xf32>
    %27 = vector.multi_reduction <minimumf>, %3, %cst_11 [0] : vector<4x128xf32> to vector<128xf32>
    %28 = vector.shape_cast %27 : vector<128xf32> to vector<1x128xf32>
    %29 = arith.minimumf %26, %28 : vector<1x128xf32>
    %30 = vector.extract_strided_slice %7 {offsets = [6, 0], sizes = [1, 128], strides = [1, 1]} : vector<8x128xf32> to vector<1x128xf32>
    %cst_12 = arith.constant dense<0xFF800000> : vector<128xf32>
    %31 = vector.multi_reduction <maximumf>, %3, %cst_12 [0] : vector<4x128xf32> to vector<128xf32>
    %32 = vector.shape_cast %31 : vector<128xf32> to vector<1x128xf32>
    %33 = arith.maximumf %30, %32 : vector<1x128xf32>
    %34 = vector.extract_strided_slice %7 {offsets = [7, 0], sizes = [1, 128], strides = [1, 1]} : vector<8x128xf32> to vector<1x128xf32>
    %35 = tpu.concatenate %25, %29, %33, %34 in 0 : vector<5x128xf32>, vector<1x128xf32>, vector<1x128xf32>, vector<1x128xf32> -> vector<8x128xf32>
    %c0_13 = arith.constant 0 : index
    %c0_14 = arith.constant 0 : index
    %36 = vector.load %arg3[%c0_13, %c0_14] : memref<8x128xf32, #tpu.memory_space<vmem>>, vector<8x128xf32>
    tpu.vector_store %arg3[%c0_13, %c0_14], %35 {strides = array<i32>} : memref<8x128xf32, #tpu.memory_space<vmem>>, vector<8x128xf32>,
    return
  }
  func.func @transform_0(%arg0: i32) -> (i32, i32) {
    %c0_i32 = arith.constant 0 : i32
    %c0_i32_0 = arith.constant 0 : i32
    return %arg0, %c0_i32 : i32, i32
  }
  func.func @transform_1(%arg0: i32) -> (i32, i32) {
    %c0_i32 = arith.constant 0 : i32
    %c0_i32_0 = arith.constant 0 : i32
    return %arg0, %c0_i32 : i32, i32
  }
  func.func @transform_2(%arg0: i32) -> (i32, i32) {
    %c0_i32 = arith.constant 0 : i32
    %c0_i32_0 = arith.constant 0 : i32
    %c0_i32_1 = arith.constant 0 : i32
    return %c0_i32, %c0_i32_0 : i32, i32
  }
}

</mosaic_0001>

<bundles_post_ra>
// kernel: tpu_custom_call.1
= control target key start
LH: loop header
LB: loop body
LE: loop exit
PB: predicated region body
PF: predicated region fallthrough
CT: control target
= control target key end

     0   :  { %7 = vsyncpa [#allocation3], 0  ;;  %s283_s0 = inlined_call_operand.hbm [shape: f32[4,128], index: 0, kind: input, shape index: {}]   ;;  %s284_s1 = inlined_call_operand.hbm [shape: f32[4,128], index: 1, kind: input, shape index: {}]   ;;  %s285_s2 = inlined_call_operand.hbm [shape: f32[8,128], index: 2, kind: output, shape index: {}]  }
   0x1   :  { %8 = vsyncpa [#allocation6], 0 }
   0x2   :  { %9 = vsyncpa [#allocation4], 0  ;;  %s15_s11 = sshll.u32 %s283_s0, 4  ;;  %s247_s12 = smov [#allocation2]   ;;  %s16_s11 = int_to_ptr.hbm [resolvable:$true] %s15_s11 }
   0x3   :  { %s17_s13 = sshll.u32 %s247_s12, 4  ;;  %s26_s16 = sshll.u32 %s284_s1, 4  ;;  %s18_s13 = int_to_ptr.vmem [resolvable:$true] %s17_s13  ;;  %s27_s16 = int_to_ptr.hbm [resolvable:$true] %s26_s16 }
   0x4   :  { %20 = dma.hbm_to_vmem [thread:$0]  %s16_s11, 64, %s18_s13, [#allocation3]  }
   0x5   :  { %s248_s17 = smov [#allocation5]  }
   0x6   :  { %s28_s18 = sshll.u32 %s248_s17, 4  ;;  %s29_s18 = int_to_ptr.vmem [resolvable:$true] %s28_s18 }
   0x7   :  { %31 = dma.hbm_to_vmem [thread:$0]  %s27_s16, 64, %s29_s18, [#allocation6]  }
   0x8   :  { %241 = dma.done.wait [#allocation3], 64  }
   0x9   :  { %242 = vsyncadd [#allocation3], 4294967232 }
   0xa   :  { %243 = dma.done.wait [#allocation6], 64  }
   0xb   :  { %244 = vsyncadd [#allocation6], 4294967232  ;;  %v51_v0 = vld [vmem:[#allocation2] sm:$0xf]  ;;  %v52_v2 = vld [vmem:[#allocation5] sm:$0xf]  ;;  %v44_v31 = vlaneseq }
   0xc   :  { %v160_v1 = vmul.f32 -1.442695, %v51_v0  ;;  %v88_v3 = vmul.f32 %v52_v2, %v51_v0  ;;  %vm53_vm0 = vcmask 1043456   ;;  %vm111_vm6 = vcmask 1040384   ;;  %s250_s0 = smov [#allocation7]   ;;  %s149_s21 = sshll.u32 %s285_s2, 4  ;;  %s150_s21 = int_to_ptr.hbm [resolvable:$true] %s149_s21 }
   0xd   :  { %v81_v6 = vsel %vm53_vm0, %v51_v0, 0.0  ;;  %v54_v10 = vsel %vm53_vm0, %v52_v2, 0.0  ;;  %v119_v11 = vsel %vm53_vm0, %v51_v0, inf  ;;  %v127_v12 = vsel %vm53_vm0, %v51_v0, -inf  ;;  %s147_s1 = sshll.u32 %s250_s0, 4  ;;  %s148_s1 = int_to_ptr.vmem [resolvable:$true] %s147_s1 }
   0xe   :  { %165 = vpow2.f32 %v160_v1  ;;  %v89_v7 = vsel %vm53_vm0, %v88_v3, 0.0  ;;  %v82_v8 = vrot.slane %v81_v6, 4  ;;  %v55_v17 = vrot.slane %v54_v10, 4 }
   0xf   :  { %v90_v9 = vrot.slane %v89_v7, 4  ;;  %v120_v19 = vrot.slane %v119_v11, 4  ;;  %v128_v20 = vrot.slane %v127_v12, 4  ;;  %v45_v42 = vshrl.u32 %v44_v31, 7 }
  0x10   :  { %v83_v15 = vadd.f32 %v82_v8, %v81_v6  ;;  %v56_v28 = vadd.f32 %v55_v17, %v54_v10  ;;  %v249_v60 = vmov 0.0   ;;  %vm113_vm8 = vcmask 1041408  }
  0x11   :  { %v91_v16 = vadd.f32 %v90_v9, %v89_v7  ;;  %v121_v27 = vmin.f32 %v119_v11, %v120_v19  ;;  %v129_v30 = vmax.f32 %v127_v12, %v128_v20  ;;  %vm46_vm5 = vcmp.eq.s32.totalorder %v45_v42, 5 }
  0x12   :  { %v84_v24 = vrot.slane %v83_v15, 2  ;;  %v57_v37 = vrot.slane %v56_v28, 2  ;;  %v47_v61 = vsel %vm46_vm5, inf, %v249_v60  ;;  %vm48_vm7 = vcmp.eq.s32.totalorder %v45_v42, 6 }
  0x13   :  { %v92_v25 = vrot.slane %v91_v16, 2  ;;  %v122_v36 = vrot.slane %v121_v27, 2  ;;  %v130_v40 = vrot.slane %v129_v30, 2  ;;  %vm115_vm9 = vcmask 1042432  }
  0x14   :  { %v166_v4 = vpop.eup %165  ;;  %v85_v33 = vadd.f32 %v84_v24, %v83_v15  ;;  %v58_v49 = vadd.f32 %v57_v37, %v56_v28  ;;  %vm135_vm10 = vcmask 1044480   ;;  %vm137_vm11 = vcmask 1045504  }
  0x15   :  { %v65_v5 = vadd.f32 1.0, %v166_v4  ;;  %v93_v34 = vadd.f32 %v92_v25, %v91_v16  ;;  %v123_v48 = vmin.f32 %v121_v27, %v122_v36  ;;  %v131_v50 = vmax.f32 %v129_v30, %v130_v40 }
  0x16   :  { %v86_v43 = vrot.slane %v85_v33, 1  ;;  %v59_v58 = vrot.slane %v58_v49, 1  ;;  %v49_v4 = vsel %vm48_vm7, -inf, %v47_v61  ;;  %vm139_vm12 = vcmask 1046528  }
  0x17   :  { %167 = vrcp.f32 %v65_v5  ;;  %v77_v18 = vand.u32 2147483648, %v65_v5  ;;  %vm71_vm1 = vweird.f32 %v65_v5  ;;  %v75_v22 = vand.u32 2147483647, %v65_v5 }
  0x18   :  { %v94_v44 = vrot.slane %v93_v34, 1  ;;  %v87_v53 = vadd.f32 %v86_v43, %v85_v33  ;;  %v124_v57 = vrot.slane %v123_v48, 1  ;;  %v132_v59 = vrot.slane %v131_v50, 1 }
  0x19   :  { %v78_v26 = vor.u32 1.1754944e-38, %v77_v18  ;;  %vm76_vm4 = vcmp.eq.f32.partialorder %v75_v22, 8.507059e+37 }
  0x1a   :  { %v95_v54 = vadd.f32 %v94_v44, %v93_v34  ;;  %v125_v3 = vmin.f32 %v123_v48, %v124_v57  ;;  %v133_v6 = vmax.f32 %v131_v50, %v132_v59 }
  0x1c   :  { %v112_v0 = vsel %vm111_vm6, %v87_v53, %v95_v54  ;;  %v126_v10 = vmin.f32 %v49_v4, %v125_v3  ;;  %v134_v12 = vmax.f32 %v49_v4, %v133_v6 }
  0x1d   :  { %v168_v13 = vpop.eup %167 }
  0x1e   :  { %v67_v14 = vmul.f32 %v168_v13, %v65_v5  ;;  %vm72_vm2 = vweird.f32 %v168_v13  ;;  %v60_v5 = vadd.f32 %v59_v58, %v58_v49 }
  0x1f   :  { %vm73_vm3 = vmor %vm71_vm1, %vm72_vm2 }
  0x20   :  { %v68_v21 = vsub.f32 1.0, %v67_v14 }
  0x22   :  { %v69_v23 = vmul.f32 %v168_v13, %v68_v21 }
  0x24   :  { %v70_v29 = vadd.f32 %v168_v13, %v69_v23 }
  0x26   :  { %v74_v32 = vsel %vm73_vm3, %v168_v13, %v70_v29 }
  0x27   :  { %v79_v35 = vsel %vm76_vm4, %v78_v26, %v74_v32 }
  0x28   :  { %v96_v38 = vsel %vm53_vm0, %v79_v35, 0.0  ;;  %v103_v39 = vmul.f32 %v79_v35, %v52_v2 }
  0x29   :  { %v97_v41 = vrot.slane %v96_v38, 4 }
  0x2a   :  { %v104_v45 = vsel %vm53_vm0, %v103_v39, 0.0 }
  0x2b   :  { %v98_v46 = vadd.f32 %v97_v41, %v96_v38  ;;  %v105_v47 = vrot.slane %v104_v45, 4 }
  0x2d   :  { %v99_v51 = vrot.slane %v98_v46, 2  ;;  %v106_v52 = vadd.f32 %v105_v47, %v104_v45 }
  0x2f   :  { %v100_v55 = vadd.f32 %v99_v51, %v98_v46  ;;  %v107_v56 = vrot.slane %v106_v52, 2 }
  0x31   :  { %v101_v62 = vrot.slane %v100_v55, 1  ;;  %v108_v63 = vadd.f32 %v107_v56, %v106_v52 }
  0x33   :  { %v102_v1 = vadd.f32 %v101_v62, %v100_v55  ;;  %v109_v2 = vrot.slane %v108_v63, 1 }
  0x35   :  { %v110_v7 = vadd.f32 %v109_v2, %v108_v63  ;;  %v114_v8 = vsel %vm113_vm8, %v112_v0, %v102_v1 }
  0x37   :  { %v116_v9 = vsel %vm115_vm9, %v114_v8, %v110_v7 }
  0x38   :  { %v117_v11 = vsel %vm53_vm0, %v116_v9, %v60_v5 }
  0x39   :  { %v118_v13 = vadd.f32 %v117_v11, %v49_v4 }
  0x3b   :  { %v136_v14 = vsel %vm135_vm10, %v118_v13, %v126_v10 }
  0x3c   :  { %v138_v15 = vsel %vm137_vm11, %v136_v14, %v134_v12 }
  0x3d   :  { %v140_v16 = vsel %vm139_vm12, %v138_v15, %v49_v4 }
  0x3e   :  { %141 = vst [vmem:[#allocation7] sm:$0xff] %v140_v16 }
  0x3f   :  { %152 = dma.vmem_to_hbm [thread:$0]  %s148_s1, 128, %s150_s21, [#allocation4]  }
  0x40   :  { %245 = dma.done.wait [#allocation4], 128  }
  0x41   :  { %246 = vsyncadd [#allocation4], 4294967168 }
  0x42   :  { %157 = vsyncpa [#allocation3], 1 }
  0x43   :  { %158 = vsyncpa [#allocation6], 1 }
  0x44   :  { %159 = vsyncpa [#allocation4], 1 }

</bundles_post_ra>
